<compile_context>
chip_gen: v6e
topology: v6e:2x2x1
jax: 0.10.0
libtpu: 0.0.40
codegen_flags: <defaults>
</compile_context>

<pallas_src>
import jax
import jax.numpy as jnp
from jax import lax
from jax.experimental import pallas as pl
from jax.experimental.pallas import tpu as pltpu

F32 = jnp.float32

_ROLL_SIGN = None


def _get_roll_sign():
    """Probe pltpu.roll's direction once so the tap shifts are always correct."""
    global _ROLL_SIGN
    if _ROLL_SIGN is None:
        def k(x_ref, o_ref):
            o_ref[...] = pltpu.roll(x_ref[...], 1, axis=0)
        v = jnp.zeros((8, 128), F32).at[0, 0].set(1.0)
        r = pl.pallas_call(k, out_shape=jax.ShapeDtypeStruct((8, 128), F32))(v)
        _ROLL_SIGN = 1 if float(r[1, 0]) == 1.0 else -1
    return _ROLL_SIGN


def _pick_tile(n):
    for t in (512, 256, 128):
        if n % t == 0:
            return t
    return n


# --------------------------------------------------------------- conv_offset ---
def _matmul_bias_kernel(w_ref, a_ref, b_ref, o_ref):
    o_ref[...] = (jnp.dot(w_ref[...], a_ref[...], preferred_element_type=F32)
                  + b_ref[...])


def conv2d_nchw(x, weight, bias, stride, pad, dil=1):
    """Plain conv2d (NCHW) = im2col (glue) + lane-dense Pallas matmul+bias kernel."""
    B, C, H, W = x.shape
    Cout, Cin, HK, WK = weight.shape
    HO = (H + 2 * pad - dil * (HK - 1) - 1) // stride + 1
    WO = (W + 2 * pad - dil * (WK - 1) - 1) // stride + 1
    xp = jnp.pad(x, ((0, 0), (0, 0), (pad, pad), (pad, pad)))
    cols = []
    for hk in range(HK):
        for wk in range(WK):
            cols.append(xp[:, :,
                           hk * dil: hk * dil + stride * (HO - 1) + 1: stride,
                           wk * dil: wk * dil + stride * (WO - 1) + 1: stride])
    cols = jnp.stack(cols, axis=2)                                  # (B,C,K2,HO,WO)
    # K-major rows (c*K2+k), lane-dense columns (b*HO*WO + p)
    A = jnp.transpose(cols, (1, 2, 0, 3, 4)).reshape(C * HK * WK, B * HO * WO)
    wmat = weight.reshape(Cout, C * HK * WK)
    bcol = bias.reshape(Cout, 1)

    M = B * HO * WO
    Kd = C * HK * WK
    TN = _pick_tile(M)
    out = pl.pallas_call(
        _matmul_bias_kernel,
        out_shape=jax.ShapeDtypeStruct((Cout, M), F32),
        grid=(M // TN,),
        in_specs=[
            pl.BlockSpec((Cout, Kd), lambda i: (0, 0)),
            pl.BlockSpec((Kd, TN), lambda i: (0, i)),
            pl.BlockSpec((Cout, 1), lambda i: (0, 0)),
        ],
        out_specs=pl.BlockSpec((Cout, TN), lambda i: (0, i)),
        compiler_params=pltpu.CompilerParams(dimension_semantics=("parallel",)),
    )(wmat, A, bcol)
    return out.reshape(Cout, B, HO, WO).transpose(1, 0, 2, 3)


# ------------------------------------------------------- sample locations glue ---
def _build_sample_locations(offset, HI, WI, HK, WK, stride, padding):
    """Replicates the reference's sample_location construction (incl. the
    permute/contiguous/view memory reinterpretation) and returns it channels-first
    with output points on the last (lane) axis: (B, 2*K2, P), rows [x_j, y_j]."""
    B, _, HO, WO = offset.shape
    K2 = HK * WK
    P = HO * WO
    hor = jnp.broadcast_to(jnp.linspace(-1.0, 1.0, WO, dtype=F32).reshape(1, 1, 1, WO),
                           (B, 1, HO, WO))
    ver = jnp.broadcast_to(jnp.linspace(-1.0, 1.0, HO, dtype=F32).reshape(1, 1, HO, 1),
                           (B, 1, HO, WO))
    x0g = hor * stride - padding
    y0g = ver * stride - padding
    locs = []
    for hk in range(HK):
        for wk in range(WK):
            c = 2 * (hk * WK + wk)
            # NOTE: the reference slices offset[:, c] without keepdim, which only
            # broadcasts for batch==1; keeping the channel dim is bit-identical for
            # batch==1 and well-defined for batch>1.
            off_y = offset[:, c:c + 1]
            off_x = offset[:, c + 1:c + 2]
            locs.append(x0g + (wk + off_x) / ((WI - 1.0) / 2.0))
            locs.append(y0g + (hk + off_y) / ((HI - 1.0) / 2.0))
    sl = jnp.concatenate(locs, axis=1)                              # (B, 2K2, HO, WO)
    sl_cl = jnp.transpose(sl, (0, 2, 3, 1))                         # (B, HO, WO, 2K2)
    # exact replication of .permute(0,2,3,1).contiguous().view(-1, HO, WO, 2)
    G = sl_cl.reshape(B, K2, HO, WO, 2)
    sl_cf = jnp.transpose(G.reshape(B, K2, P, 2), (0, 1, 3, 2)).reshape(B, 2 * K2, P)
    return sl_cf


# --------------------- fused grid_sample(mask) + modulated deformable conv ------
def _make_dcn_fused_kernel(HI, WI, K2, WK, dil, Cl, Cin, Cout, TP, roll_sign):
    HIWI = HI * WI
    # TODO(synk): for large images, replace the (HIWI, TP) one-hot with a windowed
    # image block / DMA gather so VALU work and VMEM do not scale with HI*WI.

    def rolled(a, d):
        return pltpu.roll(a, (roll_sign * d) % HIWI, axis=0)

    def kernel(sl_ref, off_ref, olo_ref, lo_ref, img_ref, base_ref, w_ref, b_ref,
               o_ref, s_ref):
        img_lo = lo_ref[0]                                   # (Cl, HIWI)
        img = img_ref[0]                                     # (Cin, HIWI)
        olo = olo_ref[0]                                     # (Cl, TP) reused for all K2
        base_y = base_ref[0:1, :]                            # (1, TP)
        base_x = base_ref[1:2, :]
        iota = lax.broadcasted_iota(jnp.int32, (HIWI, TP), 0)
        for k in range(K2):
            hk, wk = divmod(k, WK)

            # ---- modulation m_k: grid_sample(input_LO) * output_LO, sum over Cl ---
            # torch.grid_sample: bilinear, padding_mode='border', align_corners=False
            gx = sl_ref[0, 2 * k:2 * k + 1, :]               # (1, TP)
            gy = sl_ref[0, 2 * k + 1:2 * k + 2, :]
            ix = jnp.clip(((gx + 1.0) * WI - 1.0) * 0.5, 0.0, WI - 1.0)
            iy = jnp.clip(((gy + 1.0) * HI - 1.0) * 0.5, 0.0, HI - 1.0)
            mx0 = jnp.floor(ix)
            my0 = jnp.floor(iy)
            mlx = ix - mx0
            mly = iy - my0
            mflat = my0.astype(jnp.int32) * WI + mx0.astype(jnp.int32)
            moh = (iota == mflat).astype(F32)                # (HIWI, TP) base one-hot
            # other 3 bilinear taps via XLU roll; edge taps that would wrap always
            # carry exactly zero weight in border mode.
            mtaps = (moh * ((1.0 - mly) * (1.0 - mlx))
                     + rolled(moh, 1) * ((1.0 - mly) * mlx)
                     + rolled(moh, WI) * (mly * (1.0 - mlx))
                     + rolled(moh, WI + 1) * (mly * mlx))
            samp = jnp.dot(img_lo, mtaps, preferred_element_type=F32)   # (Cl, TP)
            m_k = jnp.sum(samp * olo, axis=0, keepdims=True)            # (1, TP)

            # ---- deformable bilinear gather; m_k folded into the 4 tap weights ----
            py = base_y + float(hk * dil) + off_ref[0, 2 * k:2 * k + 1, :]
            px = base_x + float(wk * dil) + off_ref[0, 2 * k + 1:2 * k + 2, :]
            y0 = jnp.floor(py)
            x0 = jnp.floor(px)
            ly = py - y0
            lx = px - x0
            vy0 = (y0 >= 0.0) & (y0 <= HI - 1.0)
            vy1 = (y0 >= -1.0) & (y0 <= HI - 2.0)
            vx0 = (x0 >= 0.0) & (x0 <= WI - 1.0)
            vx1 = (x0 >= -1.0) & (x0 <= WI - 2.0)
            # zero padding: out-of-bounds taps get weight 0; modulation folded in so
            # no full-size (HIWI,TP) multiply by the mask is needed.
            w00 = jnp.where(vy0 & vx0, (1.0 - ly) * (1.0 - lx), 0.0) * m_k
            w01 = jnp.where(vy0 & vx1, (1.0 - ly) * lx, 0.0) * m_k
            w10 = jnp.where(vy1 & vx0, ly * (1.0 - lx), 0.0) * m_k
            w11 = jnp.where(vy1 & vx1, ly * lx, 0.0) * m_k
            # int32 flat index of the (y0,x0) corner.  Clamp to [-1, dim-1] and wrap
            # negatives by +HIWI so that valid taps reached via circular roll land on
            # the right pixel; aliased/wrapped positions always carry zero weight.
            y0c = jnp.clip(y0, -1.0, HI - 1.0).astype(jnp.int32)
            x0c = jnp.clip(x0, -1.0, WI - 1.0).astype(jnp.int32)
            flat = y0c * WI + x0c
            flat = jnp.where(flat < 0, flat + HIWI, flat)
            oh = (iota == flat).astype(F32)                  # (HIWI, TP)
            taps = (oh * w00
                    + rolled(oh, 1) * w01
                    + rolled(oh, WI) * w10
                    + rolled(oh, WI + 1) * w11)
            # gather the 4 bilinear taps for all Cin channels on the MXU
            s_ref[k * Cin:(k + 1) * Cin, :] = jnp.dot(
                img, taps, preferred_element_type=F32)       # (Cin, TP)
        # single fused weight matmul: (Cout, K2*Cin) @ (K2*Cin, TP), lane-dense store
        o_ref[0] = (jnp.dot(w_ref[...], s_ref[...], preferred_element_type=F32)
                    + b_ref[...])
    return kernel


# -------------------------------------------------------------- full forward ---
def modulated_deform_conv_pack_forward(x, input_LO, output_LO, params,
                                       kernel_size=3, stride=1, padding=1,
                                       dilation=1):
    weight = params["weight"]
    bias = params["bias"]
    off_w = params["conv_offset_w"]
    off_b = params["conv_offset_b"]

    B, Cin, HI, WI = x.shape
    _, label_nc, HLI, WLI = input_LO.shape
    assert (HLI, WLI) == (HI, WI)
    HK = WK = kernel_size
    K2 = HK * WK
    Cout = weight.shape[0]
    HIWI = HI * WI

    # conv_offset (groups=1, deformable_groups=1)
    offset = conv2d_nchw(x, off_w, off_b, stride, padding, 1)    # (B, 2*K2, HO, WO)
    _, _, HO, WO = offset.shape
    P = HO * WO
    assert output_LO.shape == (B, label_nc, HO, WO)
    # torch: o1, o2 = chunk(out, 2, 1); offset = cat((o1, o2), 1)  -> identity

    TP = _pick_tile(P)
    roll_sign = _get_roll_sign()

    # ---- sample-location construction (glue, replicates the reference quirk) ----
    sl_cf = _build_sample_locations(offset, HI, WI, HK, WK, stride, padding)

    # ---- channels-first, lane-dense operands (no data-moving transposes) --------
    img_lo = input_LO.reshape(B, label_nc, HIWI)
    olo = output_LO.reshape(B, label_nc, P)          # one tile reused for all K2
    off_cf = offset.reshape(B, 2 * K2, P)
    img_cf = x.reshape(B, Cin, HIWI)
    ho = jnp.arange(HO, dtype=F32) * stride - padding
    wo = jnp.arange(WO, dtype=F32) * stride - padding
    by, bx = jnp.meshgrid(ho, wo, indexing="ij")
    base = jnp.stack([by.reshape(P), bx.reshape(P)], axis=0)      # (2, P) rows [y, x]
    w_mat = jnp.transpose(weight, (0, 2, 3, 1)).reshape(Cout, K2 * Cin)
    b_col = bias.reshape(Cout, 1)

    # ---- ONE fused kernel: grid_sample mask + modulated deformable conv ---------
    out = pl.pallas_call(
        _make_dcn_fused_kernel(HI, WI, K2, WK, dilation, label_nc, Cin, Cout,
                               TP, roll_sign),
        out_shape=jax.ShapeDtypeStruct((B, Cout, P), F32),
        grid=(B, P // TP),
        in_specs=[
            pl.BlockSpec((1, 2 * K2, TP), lambda b, t: (b, 0, t)),    # sample locs
            pl.BlockSpec((1, 2 * K2, TP), lambda b, t: (b, 0, t)),    # offsets
            pl.BlockSpec((1, label_nc, TP), lambda b, t: (b, 0, t)),  # output_LO
            pl.BlockSpec((1, label_nc, HIWI), lambda b, t: (b, 0, 0)),  # input_LO
            pl.BlockSpec((1, Cin, HIWI), lambda b, t: (b, 0, 0)),     # input image
            pl.BlockSpec((2, TP), lambda b, t: (0, t)),               # base grid
            pl.BlockSpec((Cout, K2 * Cin), lambda b, t: (0, 0)),      # weight
            pl.BlockSpec((Cout, 1), lambda b, t: (0, 0)),             # bias
        ],
        out_specs=pl.BlockSpec((1, Cout, TP), lambda b, t: (b, 0, t)),
        scratch_shapes=[pltpu.VMEM((K2 * Cin, TP), F32)],
        compiler_params=pltpu.CompilerParams(
            dimension_semantics=("parallel", "parallel")),
    )(sl_cf, off_cf, olo, img_lo, img_cf, base, w_mat, b_col)
    return out.reshape(B, Cout, HO, WO)              # already NCHW, no transpose


# --------------------------------------------------- pure-JAX reference (test) ---
def _reference_forward(x, input_LO, output_LO, params, offset,
                       ksize, stride, padding, dil):
    weight = params["weight"]
    bias = params["bias"]
    B, Cin, HI, WI = x.shape
    _, Cl, _, _ = input_LO.shape
    HK = WK = ksize
    K2 = HK * WK
    Cout = weight.shape[0]
    _, _, HO, WO = offset.shape
    P = HO * WO
    HIWI = HI * WI

    def gather(img, yy, xx):                         # img (B,C,HIWI); yy,xx (B,K2,P)
        C = img.shape[1]
        flat = (yy * WI + xx).reshape(B, 1, K2 * P)
        flat = jnp.broadcast_to(flat, (B, C, K2 * P))
        return jnp.take_along_axis(img, flat, axis=-1).reshape(B, C, K2, P)

    def cidx(v, lim):
        return jnp.clip(v, 0.0, lim - 1.0).astype(jnp.int32)

    # mask: grid_sample(border, align_corners=False) of input_LO * output_LO, summed
    sl = _build_sample_locations(offset, HI, WI, HK, WK, stride, padding)
    gx = sl[:, 0::2, :]
    gy = sl[:, 1::2, :]
    ix = jnp.clip(((gx + 1.0) * WI - 1.0) * 0.5, 0.0, WI - 1.0)
    iy = jnp.clip(((gy + 1.0) * HI - 1.0) * 0.5, 0.0, HI - 1.0)
    x0 = jnp.floor(ix); y0 = jnp.floor(iy); lx = ix - x0; ly = iy - y0
    img_lo = input_LO.reshape(B, Cl, HIWI)
    w00 = ((1 - ly) * (1 - lx))[:, None]; w01 = ((1 - ly) * lx)[:, None]
    w10 = (ly * (1 - lx))[:, None];       w11 = (ly * lx)[:, None]
    samp = (w00 * gather(img_lo, cidx(y0, HI), cidx(x0, WI))
            + w01 * gather(img_lo, cidx(y0, HI), cidx(x0 + 1, WI))
            + w10 * gather(img_lo, cidx(y0 + 1, HI), cidx(x0, WI))
            + w11 * gather(img_lo, cidx(y0 + 1, HI), cidx(x0 + 1, WI)))
    mask = jnp.sum(samp * output_LO.reshape(B, Cl, 1, P), axis=1)     # (B,K2,P)

    # modulated deformable conv (zero padding)
    off_cf = offset.reshape(B, 2 * K2, P)
    off_y = off_cf[:, 0::2, :]; off_x = off_cf[:, 1::2, :]
    ho = jnp.arange(HO, dtype=F32) * stride - padding
    wo = jnp.arange(WO, dtype=F32) * stride - padding
    by, bx = jnp.meshgrid(ho, wo, indexing="ij")
    ky = jnp.array([(k // WK) * dil for k in range(K2)], F32).reshape(1, K2, 1)
    kx = jnp.array([(k % WK) * dil for k in range(K2)], F32).reshape(1, K2, 1)
    py = by.reshape(1, 1, P) + ky + off_y
    px = bx.reshape(1, 1, P) + kx + off_x
    y0 = jnp.floor(py); x0 = jnp.floor(px); ly = py - y0; lx = px - x0
    vy0 = (y0 >= 0) & (y0 <= HI - 1); vy1 = (y0 >= -1) & (y0 <= HI - 2)
    vx0 = (x0 >= 0) & (x0 <= WI - 1); vx1 = (x0 >= -1) & (x0 <= WI - 2)
    w00 = jnp.where(vy0 & vx0, (1 - ly) * (1 - lx), 0.0)[:, None]
    w01 = jnp.where(vy0 & vx1, (1 - ly) * lx, 0.0)[:, None]
    w10 = jnp.where(vy1 & vx0, ly * (1 - lx), 0.0)[:, None]
    w11 = jnp.where(vy1 & vx1, ly * lx, 0.0)[:, None]
    img = x.reshape(B, Cin, HIWI)
    sampx = (w00 * gather(img, cidx(y0, HI), cidx(x0, WI))
             + w01 * gather(img, cidx(y0, HI), cidx(x0 + 1, WI))
             + w10 * gather(img, cidx(y0 + 1, HI), cidx(x0, WI))
             + w11 * gather(img, cidx(y0 + 1, HI), cidx(x0 + 1, WI)))
    sampx = sampx * mask[:, None]
    wr = weight.reshape(Cout, Cin, K2)
    out = jnp.einsum("ock,bckp->bop", wr, sampx) + bias.reshape(1, Cout, 1)
    return out.reshape(B, Cout, HO, WO)


if __name__ == "__main__":
    key = jax.random.PRNGKey(0)
    B, Cin, Cout = 2, 4, 8
    HI = WI = 16
    label_nc = 3
    ksize, stride, pad, dil = 3, 1, 1, 1      # groups=1, deformable_groups=1
    K2 = ksize * ksize

    k1, k2, k3, k4, k5, k6, k7 = jax.random.split(key, 7)
    x = jax.random.normal(k1, (B, Cin, HI, WI), F32)
    input_LO = jax.random.normal(k2, (B, label_nc, HI, WI), F32)
    output_LO = jax.random.normal(k3, (B, label_nc, HI, WI), F32)   # HO==HI here

    fan_in = Cin * K2
    bound = 1.0 / (fan_in ** 0.5)
    params = {
        # kaiming_uniform(a=sqrt(5)) == U(-1/sqrt(fan_in), 1/sqrt(fan_in))
        "weight": jax.random.uniform(k4, (Cout, Cin, ksize, ksize), F32, -bound, bound),
        "bias": jax.random.uniform(k5, (Cout,), F32, -bound, bound),
        # NOTE: the reference zero-inits conv_offset; small deterministic random
        # values are used instead so the fractional / OOB deformable path is exercised.
        "conv_offset_w": 0.3 * jax.random.normal(k6, (2 * K2, Cin, ksize, ksize), F32),
        "conv_offset_b": 0.1 * jax.random.normal(k7, (2 * K2,), F32),
    }

    out = modulated_deform_conv_pack_forward(
        x, input_LO, output_LO, params,
        kernel_size=ksize, stride=stride, padding=pad, dilation=dil)
    out = jax.block_until_ready(out)
    assert out.shape == (B, Cout, HI, WI)
    assert bool(jnp.all(jnp.isfinite(out)))

    # ---- validate against a pure-JAX/XLA reference of the same forward ----------
    offset_pl = conv2d_nchw(x, params["conv_offset_w"], params["conv_offset_b"],
                            stride, pad, 1)
    offset_xla = lax.conv_general_dilated(
        x, params["conv_offset_w"], (stride, stride), ((pad, pad), (pad, pad)),
        dimension_numbers=("NCHW", "OIHW", "NCHW")
    ) + params["conv_offset_b"].reshape(1, -1, 1, 1)
    off_err = float(jnp.max(jnp.abs(offset_pl - offset_xla)))
    off_scale = max(1.0, float(jnp.max(jnp.abs(offset_xla))))
    assert off_err < 0.05 * off_scale, f"conv_offset mismatch: {off_err}"

    ref = _reference_forward(x, input_LO, output_LO, params, offset_pl,
                             ksize, stride, pad, dil)
    err = float(jnp.max(jnp.abs(out - ref)))
    scale = max(1.0, float(jnp.max(jnp.abs(ref))))
    assert err < 0.05 * scale, f"deform output mismatch: {err}"

    print("KERNEL_OK")
</pallas_src>

<mosaic_0001>
module attributes {stable_mosaic.version = 11 : i64} {
  func.func @_matmul_bias_kernel(%arg0: i32, %arg1: memref<18x36xf32, #tpu.memory_space<vmem>>, %arg2: memref<36x512xf32, #tpu.memory_space<vmem>>, %arg3: memref<18x1xf32, #tpu.memory_space<vmem>>, %arg4: memref<18x512xf32, #tpu.memory_space<vmem>>) attributes {dimension_semantics = [#tpu.dimension_semantics<parallel>], iteration_bounds = array<i64: 1>, scalar_prefetch = 0 : i64, scratch_operands = 0 : i64, tpu.core_type = #tpu.core_type<tc>, window_params = [{pipeline_mode = #tpu.pipeline_mode<synchronous>, transform_indices = @transform_0, window_bounds = array<i64: 18, 36>}, {transform_indices = @transform_1, window_bounds = array<i64: 36, 512>}, {pipeline_mode = #tpu.pipeline_mode<synchronous>, transform_indices = @transform_2, window_bounds = array<i64: 18, 1>}, {transform_indices = @transform_3, window_bounds = array<i64: 18, 512>}]} {
    %c0 = arith.constant 0 : index
    %c0_0 = arith.constant 0 : index
    %0 = vector.load %arg1[%c0, %c0_0] : memref<18x36xf32, #tpu.memory_space<vmem>>, vector<18x36xf32>
    %c0_1 = arith.constant 0 : index
    %c0_2 = arith.constant 0 : index
    %1 = vector.load %arg2[%c0_1, %c0_2] : memref<36x512xf32, #tpu.memory_space<vmem>>, vector<36x512xf32>
    %cst = arith.constant dense<0.000000e+00> : vector<18x512xf32>
    %2 = tpu.matmul %0, %1, %cst {dimension_numbers = #tpu.dot_dimension_numbers<[1], [0], [0], [1], [0, 0, 1, 1], [], []>} : vector<18x36xf32>, vector<36x512xf32>, vector<18x512xf32> -> vector<18x512xf32>
    %c0_3 = arith.constant 0 : index
    %c0_4 = arith.constant 0 : index
    %3 = vector.load %arg3[%c0_3, %c0_4] : memref<18x1xf32, #tpu.memory_space<vmem>>, vector<18x1xf32>
    %4 = vector.broadcast %3 : vector<18x1xf32> to vector<18x512xf32>
    %5 = arith.addf %2, %4 : vector<18x512xf32>
    %c0_5 = arith.constant 0 : index
    %c0_6 = arith.constant 0 : index
    %6 = vector.load %arg4[%c0_5, %c0_6] : memref<18x512xf32, #tpu.memory_space<vmem>>, vector<18x512xf32>
    tpu.vector_store %arg4[%c0_5, %c0_6], %5 {strides = array<i32>} : memref<18x512xf32, #tpu.memory_space<vmem>>, vector<18x512xf32>,
    return
  }
  func.func @transform_0(%arg0: i32) -> (i32, i32) {
    %c0_i32 = arith.constant 0 : i32
    %c0_i32_0 = arith.constant 0 : i32
    %c0_i32_1 = arith.constant 0 : i32
    return %c0_i32, %c0_i32_0 : i32, i32
  }
  func.func @transform_1(%arg0: i32) -> (i32, i32) {
    %c0_i32 = arith.constant 0 : i32
    %c0_i32_0 = arith.constant 0 : i32
    return %c0_i32, %arg0 : i32, i32
  }
  func.func @transform_2(%arg0: i32) -> (i32, i32) {
    %c0_i32 = arith.constant 0 : i32
    %c0_i32_0 = arith.constant 0 : i32
    %c0_i32_1 = arith.constant 0 : i32
    return %c0_i32, %c0_i32_0 : i32, i32
  }
  func.func @transform_3(%arg0: i32) -> (i32, i32) {
    %c0_i32 = arith.constant 0 : i32
    %c0_i32_0 = arith.constant 0 : i32
    return %c0_i32, %arg0 : i32, i32
  }
}

</mosaic_0001>

<bundles_post_ra>
// kernel: tpu_custom_call.1
= control target key start
LH: loop header
LB: loop body
LE: loop exit
PB: predicated region body
PF: predicated region fallthrough
CT: control target
= control target key end

     0   :  { %8 = vsyncpa [#allocation3], 0  ;;  %s412_s0 = inlined_call_operand.vmem [shape: f32[18,36], index: 0, kind: input, shape index: {}]   ;;  %s413_s1 = inlined_call_operand.hbm [shape: f32[36,512], index: 1, kind: input, shape index: {}]   ;;  %s414_s2 = inlined_call_operand.vmem [shape: f32[18,1], index: 2, kind: input, shape index: {}]   ;;  %s415_s3 = inlined_call_operand.hbm [shape: f32[18,512], index: 3, kind: output, shape index: {}]  }
   0x1   :  { %9 = vsyncpa [#allocation4], 0  ;;  %s350_s12 = smov [#allocation2]  }
   0x2   :  { %s17_s13 = sshll.u32 %s350_s12, 4  ;;  %s18_s13 = int_to_ptr.vmem [resolvable:$true] %s17_s13 }
   0x3   :  { %s314_s14 = scalar_lea.vmem %s18_s13, 2560  ;;  %p319_p1 = scmp.lt.s32.totalorder %s18_s13, %s18_s13 }
   0x4   :  { %p315_p0 = scmp.ne.s32.totalorder %s18_s13, %s314_s14  ;;  %p320_p2 = scmp.lt.s32.totalorder %s314_s14, %s314_s14 }
   0x6   :  { %p321_p3 = por %p320_p2, %p319_p1 }
   0x8   :  { %p322_p4 = pnand %p321_p3, %p315_p0 }
   0xa   :  { %325 = shalt.err (!%p322_p4)
}
   0xb   :  { %s351_s15 = smov 512   ;;  %s352_s16 = smov 32  }
   0xc   :  { %23 = dma.hbm_to_vmem [thread:$0]  %s413_s1, 2560, %s18_s13, [#allocation3], %s351_s15, %s351_s15, %s352_s16  }
   0xd   :  { %346 = dma.done.wait [#allocation3], 2560  }
   0xe   :  { %347 = vsyncadd [#allocation3], 4294964736  ;;  %v353_v0 = vmov 0.0   ;;  %v354_v1 = vmov 0   ;;  %vm80_vm0 = vcmask 1043456   ;;  %v45_v6 = vld [vmem:[#allocation2 + $0x68] sm:$0xff] }
   0xf   :  { %157 = vmatprep.mubr.f32.mxu0 %v353_v0  ;;  %240 = vmatprep.mubr.f32.mxu1 %v353_v0  ;;  %v49_v2 = vld [vmem:[#allocation2 + $0x88] sm:$0xf]  ;;  %v51_v3 = vld [vmem:[#allocation2 + $0x98] sm:$0xf]  ;;  %v48_v4 = vld [vmem:[#allocation2 + $0x80] sm:$0xf] }
  0x10   :  { %304 = vset.pattern.permute.xlu0 %v354_v1  ;;  %305 = vset.pattern.permute.xlu1 %v354_v1  ;;  %v50_v5 = vld [vmem:[#allocation2 + $0x90] sm:$0xf]  ;;  %v47_v7 = vld [vmem:[#allocation2 + $0x78] sm:$0xff]  ;;  %v44_v8 = vld [vmem:[#allocation2 + $0x60] sm:$0xff]  ;;  %vm70_vm1 = vcmask 293888  }
  0x11   :  { %288 = vmatprep.subr.msk.mxu0 %vm80_vm0, %v49_v2  ;;  %293 = vmatprep.subr.msk.mxu1 %vm80_vm0, %v51_v3  ;;  %v46_v9 = vld [vmem:[#allocation2 + $0x70] sm:$0xff]  ;;  %v41_v10 = vld [vmem:[#allocation2 + $0x48] sm:$0xff]  ;;  %v43_v11 = vld [vmem:[#allocation2 + $0x58] sm:$0xff] }
  0x12   :  { %289 = vmatpush1.msk.msra.mxu0 %vm80_vm0, %v48_v4  ;;  %294 = vmatpush1.msk.msra.mxu1 %vm80_vm0, %v50_v5  ;;  %v40_v12 = vld [vmem:[#allocation2 + $0x40] sm:$0xff]  ;;  %v42_v13 = vld [vmem:[#allocation2 + $0x50] sm:$0xff]  ;;  %v37_v14 = vld [vmem:[#allocation2 + $0x28] sm:$0xff] }
  0x13   :  { %117 = vmatprep.subr.mxu0 %v45_v6  ;;  %200 = vmatprep.subr.mxu1 %v47_v7  ;;  %v39_v15 = vld [vmem:[#allocation2 + $0x38] sm:$0xff]  ;;  %v36_v16 = vld [vmem:[#allocation2 + $0x20] sm:$0xff]  ;;  %v38_v17 = vld [vmem:[#allocation2 + $0x30] sm:$0xff] }
  0x14   :  { %118 = vmatpush1.msra.mxu0 %v44_v8  ;;  %201 = vmatpush1.msra.mxu1 %v46_v9  ;;  %v33_v18 = vld [vmem:[#allocation2 + $0x8] sm:$0xff]  ;;  %v35_v19 = vld [vmem:[#allocation2 + $0x18] sm:$0xff]  ;;  %v32_v20 = vld [vmem:[#allocation2] sm:$0xff] }
  0x15   :  { %119 = vmatprep.subr.mxu0 %v41_v10  ;;  %202 = vmatprep.subr.mxu1 %v43_v11  ;;  %v34_v21 = vld [vmem:[#allocation2 + $0x10] sm:$0xff]  ;;  %v29_v22 = vld [vmem:[%s412_s0] sm:$0xff]  ;;  %v30_v25 = vld [vmem:[%s412_s0 + $0x8] sm:$0xff] }
  0x16   :  { %120 = vmatpush1.msra.mxu0 %v40_v12  ;;  %203 = vmatpush1.msra.mxu1 %v42_v13  ;;  %v52_v23 = vld [vmem:[%s414_s2] sm:$0xff]  ;;  %v54_v24 = vld [vmem:[%s414_s2 + $0x10] sm:$0x3]  ;;  %v53_v26 = vld [vmem:[%s414_s2 + $0x8] sm:$0xff] }
  0x17   :  { %121 = vmatprep.subr.mxu0 %v37_v14  ;;  %204 = vmatprep.subr.mxu1 %v39_v15  ;;  %v31_v27 = vld [vmem:[%s412_s0 + $0x10] sm:$0x3]  ;;  %s355_s0 = smov [#allocation5]  }
  0x18   :  { %122 = vmatpush1.msra.mxu0 %v36_v16  ;;  %205 = vmatpush1.msra.mxu1 %v38_v17  ;;  %s276_s2 = sshll.u32 %s355_s0, 4  ;;  %s277_s2 = int_to_ptr.vmem [resolvable:$true] %s276_s2 }
  0x19   :  { %123 = vmatprep.subr.mxu0 %v33_v18  ;;  %206 = vmatprep.subr.mxu1 %v35_v19  ;;  %s326_s30 = scalar_lea.vmem %s277_s2, 1536  ;;  %p331_p6 = scmp.lt.s32.totalorder %s277_s2, %s277_s2 }
  0x1a   :  { %124 = vmatpush1.msra.mxu0 %v32_v20  ;;  %207 = vmatpush1.msra.mxu1 %v34_v21  ;;  %p327_p5 = scmp.ne.s32.totalorder %s277_s2, %s326_s30  ;;  %p332_p7 = scmp.lt.s32.totalorder %s326_s30, %s326_s30 }
  0x1b   :  { %290 = vmatmul.mubr.msk.f32.vlgmr.msra.gmra.mxu0 %vm70_vm1, %v29_v22  ;;  %295 = vmatmul.mubr.msk.f32.vlgmr.msra.gmra.mxu1 %vm70_vm1, %v29_v22 }
  0x1c   :  { %163 = vmatprep.mubr.f32.mxu0 %v353_v0  ;;  %246 = vmatprep.mubr.f32.mxu1 %v353_v0  ;;  %p333_p8 = por %p332_p7, %p331_p6 }
  0x1d   :  { %57 = vperm.xlu0 %304, %v52_v23   ;;  %67 = vperm.xlu1 %305, %v54_v24  }
  0x1e   :  { %p334_p9 = pnand %p333_p8, %p327_p5 }
  0x1f   :  { %291 = vmatmul.mubr.msk.f32.gmra.mxu0 %vm70_vm1, %v30_v25  ;;  %296 = vmatmul.mubr.msk.f32.gmra.mxu1 %vm70_vm1, %v30_v25 }
  0x20   :  { %169 = vmatprep.mubr.f32.mxu0 %v353_v0  ;;  %252 = vmatprep.mubr.f32.mxu1 %v353_v0 }
  0x21   :  { %62 = vperm.xlu0 %304, %v53_v26  }
  0x23   :  { %292 = vmatmul.mubr.msk.f32.gmra.mxu0 %vm70_vm1, %v31_v27  ;;  %297 = vmatmul.mubr.msk.f32.gmra.mxu1 %vm70_vm1, %v31_v27 }
  0x98   :  { %v58_v28 = vpop.permute.xlu0 %57  ;;  %v68_v42 = vpop.permute.xlu1 %67 }
  0x9c   :  { %v63_v33 = vpop.permute.xlu0 %62 }
  0xdb   :  { %v159_v29 = vpop.f32.mrf.mxu0  ;;  %v242_v30 = vpop.f32.mrf.mxu1 }
  0xdc   :  { %v160_v31 = vadd.f32 %v159_v29, %v58_v28  ;;  %v243_v32 = vadd.f32 %v242_v30, %v58_v28 }
  0xdd   :  { %v161_v34 = vpop.f32.mrf.mxu0  ;;  %v244_v35 = vpop.f32.mrf.mxu1 }
  0xde   :  { %259 = vst [vmem:[#allocation5] sm:$0xff] %v160_v31  ;;  %261 = vst [vmem:[#allocation5 + $0x10] sm:$0xff] %v243_v32  ;;  %v162_v36 = vadd.f32 %v161_v34, %v58_v28  ;;  %v245_v37 = vadd.f32 %v244_v35, %v58_v28 }
  0xdf   :  { %v165_v38 = vpop.f32.mrf.mxu0  ;;  %v248_v39 = vpop.f32.mrf.mxu1 }
  0xe0   :  { %260 = vst [vmem:[#allocation5 + $0x8] sm:$0xff] %v162_v36  ;;  %262 = vst [vmem:[#allocation5 + $0x18] sm:$0xff] %v245_v37  ;;  %v166_v40 = vadd.f32 %v165_v38, %v63_v33  ;;  %v249_v41 = vadd.f32 %v248_v39, %v63_v33 }
  0xe1   :  { %v167_v43 = vpop.f32.mrf.mxu0  ;;  %v250_v44 = vpop.f32.mrf.mxu1 }
  0xe2   :  { %263 = vst [vmem:[#allocation5 + $0x20] sm:$0xff] %v166_v40  ;;  %265 = vst [vmem:[#allocation5 + $0x30] sm:$0xff] %v249_v41  ;;  %v168_v45 = vadd.f32 %v167_v43, %v63_v33  ;;  %v251_v46 = vadd.f32 %v250_v44, %v63_v33 }
  0xe3   :  { %v171_v47 = vpop.f32.mrf.mxu0  ;;  %v254_v48 = vpop.f32.mrf.mxu1 }
  0xe4   :  { %264 = vst [vmem:[#allocation5 + $0x28] sm:$0xff] %v168_v45  ;;  %266 = vst [vmem:[#allocation5 + $0x38] sm:$0xff] %v251_v46  ;;  %v172_v49 = vadd.f32 %v171_v47, %v68_v42  ;;  %v255_v50 = vadd.f32 %v254_v48, %v68_v42 }
  0xe5   :  { %v173_v51 = vpop.f32.mrf.mxu0  ;;  %v256_v52 = vpop.f32.mrf.mxu1 }
  0xe6   :  { %267 = vst [vmem:[#allocation5 + $0x40] sm:$0x3] %v172_v49  ;;  %269 = vst [vmem:[#allocation5 + $0x50] sm:$0x3] %v255_v50  ;;  %v174_v53 = vadd.f32 %v173_v51, %v68_v42  ;;  %v257_v54 = vadd.f32 %v256_v52, %v68_v42 }
  0xe8   :  { %268 = vst [vmem:[#allocation5 + $0x48] sm:$0x3] %v174_v53  ;;  %270 = vst [vmem:[#allocation5 + $0x58] sm:$0x3] %v257_v54 }
  0xe9   :  { %337 = shalt.err (!%p334_p9)
}
  0xea   :  { %282 = dma.vmem_to_hbm [thread:$0]  %s277_s2, 1536, %s415_s3, [#allocation4], %s351_s15, %s351_s15, %s352_s16  }
  0xeb   :  { %348 = dma.done.wait [#allocation4], 1536  }
  0xec   :  { %349 = vsyncadd [#allocation4], 4294965760 }
  0xed   :  { %286 = vsyncpa [#allocation3], 1 }
  0xee   :  { %287 = vsyncpa [#allocation4], 1 }

</bundles_post_ra>
